<compile_context>
chip_gen: v7x
topology: tpu7x:2x2x1
jax: 0.10.0
libtpu: 0.0.40
codegen_flags: <defaults>
</compile_context>

<pallas_src>
import jax
import jax.numpy as jnp
from jax.experimental import pallas as pl
from jax.experimental.pallas import tpu as pltpu


def _add_pos_kernel(x_ref, pe_ref, o_ref):
    # x_ref: (TB, TN) tile of the flattened input
    # pe_ref: (1, TN) tile of the flattened positional embedding (row-broadcast)
    o_ref[...] = (x_ref[...] + pe_ref[...]).astype(o_ref.dtype)


def _sublane_multiple(itemsize):
    # 32-bit dtypes pack 8 rows per vreg sublane group, 16-bit pack 16, 8-bit pack 32.
    return max(8, 8 * (4 // max(1, itemsize)))


def _device_kind():
    try:
        return jax.devices()[0].device_kind.lower()
    except Exception:
        return ""


def _default_target_tile_bytes(kind):
    if "v7" in kind or "7x" in kind:
        return 8 * 1024 * 1024   # needs vmem_limit_bytes raised (handled below)
    if "v6" in kind:
        return 4 * 1024 * 1024   # ~17 MiB live, under v6e's 32 MiB default scoped VMEM
    return 2 * 1024 * 1024       # v5e / unknown: ~9 MiB live, under 16 MiB default


def _choose_tiles(B, N, itemsize, target_bytes):
    """Pick (TB, TN) so TB*TN*itemsize ~= target_bytes and the (8,128) rule holds."""
    sm = _sublane_multiple(itemsize)

    # Lane (minor) axis: multiples of 128; full extent only if N < 128.
    tn_cap = N if N < 128 else (N // 128) * 128

    # Provisional sublane tile = the smallest legal one; the lane budget is
    # derived from the tile we will actually use (matters when B < sm).
    tb0 = B if B <= sm else sm
    if N < 128:
        tn = N
    else:
        lane_budget = max(128, (target_bytes // max(1, tb0 * itemsize)) // 128 * 128)
        tn = min(tn_cap, lane_budget)

    # Grow the sublane tile to consume the remaining byte budget.
    if B <= sm:
        tb = B                                   # full-extent sublane block (e.g. B == 2)
    else:
        row_budget = max(sm, (target_bytes // max(1, tn * itemsize)) // sm * sm)
        tb_cap = B if B % sm == 0 else (B // sm) * sm   # partial final block handled by Pallas
        tb = max(sm, min(tb_cap, row_budget))
    return tb, tn


def learned_positional_encoding(x, position_embeddings, *,
                                target_tile_bytes=None,
                                donate_into_x=False):
    """x: (B, S, E); position_embeddings: (1, S, E). Returns x + pos (broadcast on B)."""
    B, S, E = x.shape
    assert position_embeddings.shape == (1, S, E)
    N = S * E

    # Lane-dense layout: flatten (S, E) so the minor dim can be tiled in
    # 128-lane multiples even when E < 128 (E=32 in the reference config).
    x2 = x.reshape(B, N)
    pe2 = position_embeddings.reshape(1, N)

    kind = _device_kind()
    if target_tile_bytes is None:
        target_tile_bytes = _default_target_tile_bytes(kind)

    itemsize = x.dtype.itemsize
    tb, tn = _choose_tiles(B, N, itemsize, target_tile_bytes)
    # Batch is the innermost grid axis so the PE block stays resident across it.
    grid = (pl.cdiv(N, tn), pl.cdiv(B, tb))

    # VMEM accounting: double-buffered x + out tiles dominate (~4x tile bytes),
    # plus the double-buffered PE row tile.  Only raise the scoped limit when
    # the default (16/32 MiB) would be exceeded (the v7x big-tile case).
    vmem_need = (4 * tb * tn * itemsize
                 + 2 * tn * position_embeddings.dtype.itemsize
                 + (1 << 20))
    vmem_limit = int(vmem_need * 1.25) if vmem_need > (24 << 20) else None

    cost = pl.CostEstimate(
        flops=B * N,
        transcendentals=0,
        bytes_accessed=(2 * B * N + N) * itemsize,
    )

    # Optional in-place write over x2 (caller must donate x for this to avoid a copy).
    io_aliases = {0: 0} if donate_into_x else {}

    def call(dim_semantics):
        return pl.pallas_call(
            _add_pos_kernel,
            out_shape=jax.ShapeDtypeStruct((B, N), x.dtype),
            grid_spec=pl.GridSpec(
                grid=grid,
                in_specs=[
                    # x tile: depends on both grid axes
                    pl.BlockSpec((tb, tn), lambda n, b: (b, n)),
                    # PE tile: block index constant across inner b loop -> not re-fetched
                    pl.BlockSpec((1, tn), lambda n, b: (0, n)),
                ],
                out_specs=pl.BlockSpec((tb, tn), lambda n, b: (b, n)),
            ),
            compiler_params=pltpu.CompilerParams(
                dimension_semantics=dim_semantics,
                vmem_limit_bytes=vmem_limit,
            ),
            cost_estimate=cost,
            input_output_aliases=io_aliases,
        )(x2, pe2)

    is_v7 = ("v7" in kind) or ("7x" in kind)
    out2 = None
    if is_v7 and grid[0] >= 2 and hasattr(pltpu, "CORE_PARALLEL"):
        # Shard the outer N-tile axis across the 2 TensorCores; keep the inner
        # batch axis "arbitrary" so PE-block reuse is preserved per core.
        try:
            out2 = call((pltpu.CORE_PARALLEL, pltpu.ARBITRARY))
        except Exception:
            out2 = None  # fall back to single-core semantics below
    if out2 is None:
        out2 = call(("parallel", "arbitrary"))

    return out2.reshape(B, S, E)


if __name__ == "__main__":
    # Case 1: small config consistent with the module's forward (B=2, S=8, E=32).
    seq_length, embedding_dim, batch = 8, 32, 2
    kx, kp = jax.random.split(jax.random.PRNGKey(0))
    x = jax.random.normal(kx, (batch, seq_length, embedding_dim), dtype=jnp.float32)
    # PyTorch initializes the parameter to zeros; random init here so the
    # broadcast-add actually exercises the kernel.
    position_embeddings = jax.random.normal(
        kp, (1, seq_length, embedding_dim), dtype=jnp.float32
    )
    out = jax.block_until_ready(learned_positional_encoding(x, position_embeddings))
    assert out.shape == x.shape and out.dtype == x.dtype
    assert jnp.allclose(out, x + position_embeddings, atol=1e-6, rtol=1e-6)

    # Case 2: non-128-multiple N (S*E = 360), non-multiple-of-8 batch, tiny tile
    # budget -> exercises the multi-step grid with partial blocks on both axes.
    kx2, kp2 = jax.random.split(jax.random.PRNGKey(1))
    B2, S2, E2 = 10, 9, 40
    x_b = jax.random.normal(kx2, (B2, S2, E2), dtype=jnp.float32)
    pe_b = jax.random.normal(kp2, (1, S2, E2), dtype=jnp.float32)
    out_b = jax.block_until_ready(
        learned_positional_encoding(x_b, pe_b, target_tile_bytes=4096)
    )
    assert jnp.allclose(out_b, x_b + pe_b, atol=1e-6, rtol=1e-6)

    # Case 3: bf16 activations with fp32 PE (mixed precision) -> exercises the
    # dtype-aware sublane tiling and the promote-then-cast path.
    kx3, kp3 = jax.random.split(jax.random.PRNGKey(2))
    B3, S3, E3 = 16, 64, 32
    x_h = jax.random.normal(kx3, (B3, S3, E3), dtype=jnp.float32).astype(jnp.bfloat16)
    pe_h = jax.random.normal(kp3, (1, S3, E3), dtype=jnp.float32)
    out_h = jax.block_until_ready(learned_positional_encoding(x_h, pe_h))
    ref_h = (x_h.astype(jnp.float32) + pe_h).astype(jnp.bfloat16)
    assert out_h.dtype == jnp.bfloat16
    assert jnp.allclose(out_h.astype(jnp.float32), ref_h.astype(jnp.float32),
                        atol=2e-2, rtol=2e-2)

    print("KERNEL_OK")
</pallas_src>

<mosaic_0001>
module attributes {stable_mosaic.version = 11 : i64} {
  func.func @_add_pos_kernel(%arg0: i32, %arg1: i32, %arg2: memref<2x256xf32, #tpu.memory_space<vmem>>, %arg3: memref<1x256xf32, #tpu.memory_space<vmem>>, %arg4: memref<2x256xf32, #tpu.memory_space<vmem>>) attributes {dimension_semantics = [#tpu.dimension_semantics<parallel>, #tpu.dimension_semantics<arbitrary>], iteration_bounds = array<i64: 1, 1>, scalar_prefetch = 0 : i64, scratch_operands = 0 : i64, tpu.core_type = #tpu.core_type<tc>, window_params = [{transform_indices = @transform_0, window_bounds = array<i64: 2, 256>}, {transform_indices = @transform_1, window_bounds = array<i64: 1, 256>}, {transform_indices = @transform_2, window_bounds = array<i64: 2, 256>}]} {
    %c0 = arith.constant 0 : index
    %c0_0 = arith.constant 0 : index
    %0 = vector.load %arg2[%c0, %c0_0] : memref<2x256xf32, #tpu.memory_space<vmem>>, vector<2x256xf32>
    %c0_1 = arith.constant 0 : index
    %c0_2 = arith.constant 0 : index
    %1 = vector.load %arg3[%c0_1, %c0_2] : memref<1x256xf32, #tpu.memory_space<vmem>>, vector<1x256xf32>
    %2 = vector.broadcast %1 : vector<1x256xf32> to vector<2x256xf32>
    %3 = arith.addf %0, %2 : vector<2x256xf32>
    %c0_3 = arith.constant 0 : index
    %c0_4 = arith.constant 0 : index
    %4 = vector.load %arg4[%c0_3, %c0_4] : memref<2x256xf32, #tpu.memory_space<vmem>>, vector<2x256xf32>
    tpu.vector_store %arg4[%c0_3, %c0_4], %3 {strides = array<i32>} : memref<2x256xf32, #tpu.memory_space<vmem>>, vector<2x256xf32>,
    return
  }
  func.func @transform_0(%arg0: i32, %arg1: i32) -> (i32, i32) {
    %c0_i32 = arith.constant 0 : i32
    return %arg1, %arg0 : i32, i32
  }
  func.func @transform_1(%arg0: i32, %arg1: i32) -> (i32, i32) {
    %c0_i32 = arith.constant 0 : i32
    %c0_i32_0 = arith.constant 0 : i32
    return %c0_i32, %arg0 : i32, i32
  }
  func.func @transform_2(%arg0: i32, %arg1: i32) -> (i32, i32) {
    %c0_i32 = arith.constant 0 : i32
    return %arg1, %arg0 : i32, i32
  }
}

</mosaic_0001>

<bundles_post_ra>
// kernel: tpu_custom_call.1
= control target key start
LH: loop header
LB: loop body
LE: loop exit
PB: predicated region body
PF: predicated region fallthrough
CT: control target
= control target key end

     0   :  { %7 = vsyncpa [#allocation3], 0  ;;  %s157_s0 = inlined_call_operand.hbm [shape: f32[2,256], index: 0, kind: input, shape index: {}]   ;;  %s158_s1 = inlined_call_operand.vmem [shape: f32[1,256], index: 1, kind: input, shape index: {}]   ;;  %s159_s2 = inlined_call_operand.hbm [shape: f32[2,256], index: 2, kind: output, shape index: {}]  }
   0x1   :  { %8 = vsyncpa [#allocation4], 0  ;;  %s112_s9 = smov [#allocation2]   ;;  %s64_s13 = scalar_lea.hbm %s157_s0, 64 }
   0x2   :  { %s15_s10 = sshll.u32 %s112_s9, 4  ;;  %p65_p0 = scmp.ne.s32.totalorder %s157_s0, %s64_s13  ;;  %s16_s10 = int_to_ptr.vmem [resolvable:$true] %s15_s10 }
   0x3   :  { %p68_p1 = scmp.lt.u32.totalorder %s64_s13, %s157_s0 }
   0x5   :  { %p70_p2 = pnand %p68_p1, %p65_p0 }
   0x7   :  { %73 = shalt.err (!%p70_p2)
}
   0x8   :  { %s74_s18 = scalar_lea.vmem %s16_s10, 64  ;;  %p79_p4 = scmp.lt.s32.totalorder %s16_s10, %s16_s10 }
   0x9   :  { %p75_p3 = scmp.ne.s32.totalorder %s16_s10, %s74_s18  ;;  %p80_p5 = scmp.lt.s32.totalorder %s74_s18, %s74_s18 }
   0xb   :  { %p81_p6 = por %p80_p5, %p79_p4 }
   0xd   :  { %p82_p7 = pnand %p81_p6, %p75_p3 }
   0xf   :  { %85 = shalt.err (!%p82_p7)
}
  0x10   :  { %18 = dma.hbm_to_vmem [thread:$0]  %s157_s0, 64, %s16_s10, [#allocation3]  }
  0x11   :  { %108 = dma.done.wait [#allocation3], 64  }
  0x12   :  { %109 = vsyncadd [#allocation3], 4294967232  ;;  %v27_v0 = vlaneseq  ;;  %v113_v1 = vmov 1983009808   ;;  %v25_v7 = vld [vmem:[%s158_s1] sm:$0x3] }
  0x13   :  { %v37_v2 = vunpack.c.l.s4 %v113_v1  ;;  %v24_v12 = vld [vmem:[#allocation2] sm:$0xf]  ;;  %s114_s23 = smov [#allocation5]  }
  0x14   :  { %v28_v3 = vshrl.u32 %v27_v0, 7  ;;  %s52_s0 = sshll.u32 %s114_s23, 4  ;;  %s53_s0 = int_to_ptr.vmem [resolvable:$true] %s52_s0 }
  0x15   :  { %v38_v6 = vunpack.c.0.s8 %v37_v2  ;;  %s86_s24 = scalar_lea.vmem %s53_s0, 64  ;;  %p91_p9 = scmp.lt.s32.totalorder %s53_s0, %s53_s0 }
  0x16   :  { %v29_v4 = vsub.s32 0, %v28_v3  ;;  %v33_v5 = vsub.s32 1, %v28_v3  ;;  %p87_p8 = scmp.ne.s32.totalorder %s53_s0, %s86_s24  ;;  %p92_p10 = scmp.lt.s32.totalorder %s86_s24, %s86_s24 }
  0x17   :  { %v41_v10 = vsub.s32 %v38_v6, %v28_v3 }
  0x18   :  { %v30_v8 = vrot.slane %v25_v7, %v29_v4  ;;  %v34_v9 = vrot.slane %v25_v7, %v33_v5  ;;  %p93_p11 = por %p92_p10, %p91_p9 }
  0x1a   :  { %v35_v11 = vcombine.low %v30_v8, %v34_v9  ;;  %p94_p12 = pnand %p93_p11, %p87_p8 }
  0x1c   :  { %v42_v13 = vrot.slane %v35_v11, %v41_v10 }
  0x1e   :  { %v44_v14 = vadd.f32 %v42_v13, %v24_v12 }
  0x20   :  { %45 = vst [vmem:[#allocation5] sm:$0xf] %v44_v14 }
  0x21   :  { %97 = shalt.err (!%p94_p12)
}
  0x22   :  { %s98_s26 = scalar_lea.hbm %s159_s2, 64 }
  0x23   :  { %p99_p13 = scmp.ne.s32.totalorder %s159_s2, %s98_s26  ;;  %p102_p0 = scmp.lt.u32.totalorder %s98_s26, %s159_s2 }
  0x25   :  { %p104_p1 = pnand %p102_p0, %p99_p13 }
  0x27   :  { %107 = shalt.err (!%p104_p1)
}
  0x28   :  { %55 = dma.vmem_to_hbm [thread:$0]  %s53_s0, 64, %s159_s2, [#allocation4]  }
  0x29   :  { %110 = dma.done.wait [#allocation4], 64  }
  0x2a   :  { %111 = vsyncadd [#allocation4], 4294967232 }
  0x2b   :  { %59 = vsyncpa [#allocation3], 1 }
  0x2c   :  { %60 = vsyncpa [#allocation4], 1 }

</bundles_post_ra>
